<compile_context>
chip_gen: v7x
topology: tpu7x:2x2x1
jax: 0.10.0
libtpu: 0.0.40
codegen_flags: <defaults>
</compile_context>

<pallas_src>
import functools
import math

import jax
import jax.numpy as jnp
import numpy as np
from jax.experimental import pallas as pl
from jax.experimental.pallas import tpu as pltpu


def head_kernel(x_ref, w_ref, b_ref, o_ref, *, C, top, left, out_h, out_w):
    """One grid step == one batch element.

    x_ref : (C, H, W) VMEM        -- the C channel planes of this element.
    w_ref : (C,)      SMEM        -- 1x1-conv weights.
    b_ref : (1,)      SMEM        -- bias.
    o_ref : (1, out_h, out_w) VMEM -- cropped single-channel output.
    """
    # VPU weighted sum over channels (scalar broadcast from SMEM), f32 accum.
    acc = x_ref[0] * w_ref[0]
    for c in range(1, C):
        acc = acc + x_ref[c] * w_ref[c]
    acc = acc + b_ref[0]
    # Fused CenterCrop: static slice, then a lane-dense store (out_w on lanes).
    o_ref[0] = acc[top:top + out_h, left:left + out_w].astype(o_ref.dtype)


def head_forward(x_nchw, weight, bias, out_h, out_w):
    """Forward pass of Head: 1x1 conv (C -> 1) followed by CenterCrop.

    x_nchw : (N, C, H, W) float32
    weight : (1, C, 1, 1) float32  (PyTorch Conv2d weight shape)
    bias   : (1,) float32
    returns: (N, 1, out_h, out_w) float32
    """
    N, C, H, W = x_nchw.shape
    if out_h > H or out_w > W:
        # TODO(synk): torchvision CenterCrop zero-pads when the crop exceeds the
        # image size; only the crop <= image case is implemented here.
        raise NotImplementedError("crop larger than image is not supported")

    # torchvision CenterCrop offsets.
    top = int(round((H - out_h) / 2.0))
    left = int(round((W - out_w) / 2.0))

    # Free reshape (collapses leading dims of a contiguous NCHW array).
    x = x_nchw.reshape(N * C, H, W).astype(jnp.float32)
    w = weight.reshape(C).astype(jnp.float32)
    b = bias.reshape(1).astype(jnp.float32)

    kernel = functools.partial(head_kernel, C=C, top=top, left=left,
                               out_h=out_h, out_w=out_w)

    # TODO(synk): the input block covers the full (H, W) plane, so rows outside
    # the crop window are still DMA'd (and VMEM use grows with C*H*W); for very
    # large images, additionally tile H to skip them and bound VMEM.
    out = pl.pallas_call(
        kernel,
        out_shape=jax.ShapeDtypeStruct((N, out_h, out_w), jnp.float32),
        grid_spec=pltpu.PrefetchScalarGridSpec(
            num_scalar_prefetch=0,
            grid=(N,),
            in_specs=[
                # One batch element's C channel planes per step (native NCHW).
                pl.BlockSpec((C, H, W), lambda n: (n, 0, 0)),
                # Scalars on the scalar path.
                pl.BlockSpec(memory_space=pltpu.MemorySpace.SMEM),
                pl.BlockSpec(memory_space=pltpu.MemorySpace.SMEM),
            ],
            out_specs=pl.BlockSpec((1, out_h, out_w), lambda n: (n, 0, 0)),
        ),
        compiler_params=pltpu.CompilerParams(
            dimension_semantics=("parallel",)),
    )(x, w, b)

    return out[:, None, :, :]  # (N, 1, out_h, out_w)


if __name__ == "__main__":
    # Small deterministic example consistent with Head(height, width, channels).
    N, C, H, W = 2, 4, 16, 16
    crop_h, crop_w = 12, 10

    key = jax.random.PRNGKey(0)
    kx, kw, kb = jax.random.split(key, 3)
    x = jax.random.normal(kx, (N, C, H, W), dtype=jnp.float32)

    # Deterministic parameter init matching nn.Conv2d(channels, 1, 1) shapes.
    fan_in = C  # kernel_size = 1x1
    bound = 1.0 / math.sqrt(fan_in)
    weight = jax.random.uniform(kw, (1, C, 1, 1), dtype=jnp.float32,
                                minval=-bound, maxval=bound)
    bias = jax.random.uniform(kb, (1,), dtype=jnp.float32,
                              minval=-bound, maxval=bound)

    y = head_forward(x, weight, bias, crop_h, crop_w)
    y = jax.block_until_ready(y)

    # Plain-JAX reference check (1x1 conv == channel contraction, then crop).
    ref_full = jnp.einsum("nchw,c->nhw", x, weight.reshape(C)) + bias[0]
    ref_full = ref_full[:, None, :, :]
    top = int(round((H - crop_h) / 2.0))
    left = int(round((W - crop_w) / 2.0))
    ref = ref_full[:, :, top:top + crop_h, left:left + crop_w]

    assert y.shape == (N, 1, crop_h, crop_w), y.shape
    np.testing.assert_allclose(np.asarray(y), np.asarray(ref),
                               rtol=1e-5, atol=1e-5)
    print("KERNEL_OK")
</pallas_src>

<mosaic_0001>
module attributes {stable_mosaic.version = 11 : i64} {
  func.func @head_kernel(%arg0: i32, %arg1: memref<4x16x16xf32, #tpu.memory_space<vmem>>, %arg2: memref<4xf32, #tpu.memory_space<smem>>, %arg3: memref<1xf32, #tpu.memory_space<smem>>, %arg4: memref<1x12x10xf32, #tpu.memory_space<vmem>>) attributes {dimension_semantics = [#tpu.dimension_semantics<parallel>], iteration_bounds = array<i64: 2>, scalar_prefetch = 0 : i64, scratch_operands = 0 : i64, tpu.core_type = #tpu.core_type<tc>, window_params = [{transform_indices = @transform_0, window_bounds = array<i64: 4, 16, 16>}, {transform_indices = @transform_1, window_bounds = array<i64: 4>}, {transform_indices = @transform_2, window_bounds = array<i64: 1>}, {transform_indices = @transform_3, window_bounds = array<i64: 1, 12, 10>}]} {
    %c0 = arith.constant 0 : index
    %c0_0 = arith.constant 0 : index
    %c0_1 = arith.constant 0 : index
    %0 = vector.load %arg1[%c0, %c0_0, %c0_1] : memref<4x16x16xf32, #tpu.memory_space<vmem>>, vector<1x16x16xf32>
    %1 = vector.shape_cast %0 : vector<1x16x16xf32> to vector<16x16xf32>
    %c0_2 = arith.constant 0 : index
    %2 = memref.load %arg2[%c0_2] : memref<4xf32, #tpu.memory_space<smem>>
    %3 = vector.broadcast %2 : f32 to vector<16x16xf32>
    %4 = arith.mulf %1, %3 : vector<16x16xf32>
    %c1 = arith.constant 1 : index
    %c0_3 = arith.constant 0 : index
    %c0_4 = arith.constant 0 : index
    %5 = vector.load %arg1[%c1, %c0_3, %c0_4] : memref<4x16x16xf32, #tpu.memory_space<vmem>>, vector<1x16x16xf32>
    %6 = vector.shape_cast %5 : vector<1x16x16xf32> to vector<16x16xf32>
    %c1_5 = arith.constant 1 : index
    %7 = memref.load %arg2[%c1_5] : memref<4xf32, #tpu.memory_space<smem>>
    %8 = vector.broadcast %7 : f32 to vector<16x16xf32>
    %9 = arith.mulf %6, %8 : vector<16x16xf32>
    %10 = arith.addf %4, %9 : vector<16x16xf32>
    %c2 = arith.constant 2 : index
    %c0_6 = arith.constant 0 : index
    %c0_7 = arith.constant 0 : index
    %11 = vector.load %arg1[%c2, %c0_6, %c0_7] : memref<4x16x16xf32, #tpu.memory_space<vmem>>, vector<1x16x16xf32>
    %12 = vector.shape_cast %11 : vector<1x16x16xf32> to vector<16x16xf32>
    %c2_8 = arith.constant 2 : index
    %13 = memref.load %arg2[%c2_8] : memref<4xf32, #tpu.memory_space<smem>>
    %14 = vector.broadcast %13 : f32 to vector<16x16xf32>
    %15 = arith.mulf %12, %14 : vector<16x16xf32>
    %16 = arith.addf %10, %15 : vector<16x16xf32>
    %c3 = arith.constant 3 : index
    %c0_9 = arith.constant 0 : index
    %c0_10 = arith.constant 0 : index
    %17 = vector.load %arg1[%c3, %c0_9, %c0_10] : memref<4x16x16xf32, #tpu.memory_space<vmem>>, vector<1x16x16xf32>
    %18 = vector.shape_cast %17 : vector<1x16x16xf32> to vector<16x16xf32>
    %c3_11 = arith.constant 3 : index
    %19 = memref.load %arg2[%c3_11] : memref<4xf32, #tpu.memory_space<smem>>
    %20 = vector.broadcast %19 : f32 to vector<16x16xf32>
    %21 = arith.mulf %18, %20 : vector<16x16xf32>
    %22 = arith.addf %16, %21 : vector<16x16xf32>
    %c0_12 = arith.constant 0 : index
    %23 = memref.load %arg3[%c0_12] : memref<1xf32, #tpu.memory_space<smem>>
    %24 = vector.broadcast %23 : f32 to vector<16x16xf32>
    %25 = arith.addf %22, %24 : vector<16x16xf32>
    %26 = vector.extract_strided_slice %25 {offsets = [2, 3], sizes = [12, 10], strides = [1, 1]} : vector<16x16xf32> to vector<12x10xf32>
    %c0_13 = arith.constant 0 : index
    %c0_14 = arith.constant 0 : index
    %c0_15 = arith.constant 0 : index
    %27 = vector.load %arg4[%c0_13, %c0_14, %c0_15] : memref<1x12x10xf32, #tpu.memory_space<vmem>>, vector<1x12x10xf32>
    %28 = vector.shape_cast %27 : vector<1x12x10xf32> to vector<12x10xf32>
    %29 = vector.shape_cast %26 : vector<12x10xf32> to vector<1x12x10xf32>
    tpu.vector_store %arg4[%c0_13, %c0_14, %c0_15], %29 {strides = array<i32>} : memref<1x12x10xf32, #tpu.memory_space<vmem>>, vector<1x12x10xf32>,
    return
  }
  func.func @transform_0(%arg0: i32) -> (i32, i32, i32) {
    %c0_i32 = arith.constant 0 : i32
    %c0_i32_0 = arith.constant 0 : i32
    %c0_i32_1 = arith.constant 0 : i32
    return %arg0, %c0_i32, %c0_i32_0 : i32, i32, i32
  }
  func.func @transform_1(%arg0: i32) -> i32 {
    %c0_i32 = arith.constant 0 : i32
    %c0_i32_0 = arith.constant 0 : i32
    return %c0_i32 : i32
  }
  func.func @transform_2(%arg0: i32) -> i32 {
    %c0_i32 = arith.constant 0 : i32
    %c0_i32_0 = arith.constant 0 : i32
    return %c0_i32 : i32
  }
  func.func @transform_3(%arg0: i32) -> (i32, i32, i32) {
    %c0_i32 = arith.constant 0 : i32
    %c0_i32_0 = arith.constant 0 : i32
    %c0_i32_1 = arith.constant 0 : i32
    return %arg0, %c0_i32, %c0_i32_0 : i32, i32, i32
  }
}

</mosaic_0001>

<bundles_post_ra>
// kernel: tpu_custom_call.1
= control target key start
LH: loop header
LB: loop body
LE: loop exit
PB: predicated region body
PF: predicated region fallthrough
CT: control target
= control target key end

     0   :  { %s662_s0 = inlined_call_operand.hbm [shape: f32[8,16,16], index: 0, kind: input, shape index: {}]   ;;  %s663_s1 = inlined_call_operand.vmem [shape: f32[4], index: 1, kind: input, shape index: {}]   ;;  %s664_s2 = inlined_call_operand.<no memory space> [shape: f32[1], index: 2, kind: input, shape index: {}]   ;;  %s665_s3 = inlined_call_operand.vmem [shape: f32[2,12,10], index: 3, kind: output, shape index: {}]  }
   0x1   :  { %8 = sst [smem:[#allocation2]] %s664_s2 }
   0x2   :  { %9 = vsyncpa [#allocation4], 0 }
   0x3   :  { %11 = vsyncpa [#allocation4 + $0x1], 0 }
   0x4   :  { %12 = vsyncpa [#allocation5], 0  ;;  %s529_s14 = smov 0   ;;  %s531_s15 = smov 0  }
   0x5   :  { %s533_s16 = smov 0   ;;  %s535_s17 = smov 0  }
   0x6 LB: > { %s548_s2 = sadd.s32 4294967295, %s499_s17   ;;  %s551_s18 = sadd.s32 1, %s499_s17   ;;  %s499_s17 = sphi %s535_s17, %s677_s17   ;;  %s495_s16 = sphi %s533_s16, %s676_s16   ;;  %s491_s15 = sphi %s531_s15, %s675_s15   ;;  %s487_s14 = sphi %s529_s14, %s674_s14  }
   0x7   : > { %s22_s19 = ssub.s32 %s499_s17, %s551_s18  ;;  %s25_s20 = sadd.s32 1, %s495_s16 }
   0x8   : > { %p23_p0 = scmp.eq.s32.totalorder %s22_s19, 0  ;;  %p32_p1 = scmp.ne.s32.totalorder %s495_s16, %s491_s15 }
   0x9   : > { %p33_p2 = scmp.eq.s32.totalorder %s499_s17, 0  ;;  %p38_p3 = scmp.ne.s32.totalorder %s491_s15, %s487_s14 }
   0xa   : > { %s561_s21 = scalar_select %p23_p0, %s495_s16, %s25_s20  }
   0xb   : > { %p34_p4 = por %p33_p2, %p32_p1  ;;  %p39_p5 = scmp.eq.s32.totalorder %s548_s2, 0 }
   0xc   : > { %p337_p6 = scmp.ge.s32.totalorder %s499_s17, 1  ;;  %p117_p7 = scmp.lt.s32.totalorder %s499_s17, 3 }
   0xd   : > { %p568_p8 = por %p39_p5, %p38_p3  ;;  %s130_s26 = sshll.u32 %s663_s1, 4  ;;  %s131_s26 = int_to_ptr.vmem [resolvable:$true] %s130_s26 }
   0xe   : > { %p572_p9 = pnand %p337_p6, %p117_p7  ;;  %p378_p11 = scmp.lt.s32.totalorder %s499_s17, 2 }
   0xf   : > { %s668_s22 = scalar_select %p568_p8, 1, 0 }
  0x10   : > { %s669_s23 = scalar_select %p572_p9, 1, 0 }
  0x11   : > { %p369_p10 = pneg %p572_p9  ;;  %s144_s27 = sand.u32 1, %s495_s16  }
  0x12   : > { %p589_p13 = pnand %p378_p11, %p34_p4  ;;  %s340_s30 = sshll.u32 %s144_s27, 6 }
  0x13   : > { %p585_p12 = pnand %p369_p10, %p39_p5  ;;  %s416_s4 = scalar_lea.vmem %s131_s26, 16 }
  0x14   : > { %p417_p0 = scmp.ne.s32.totalorder %s131_s26, %s416_s4  ;;  %p424_p6 = scmp.lt.s32.totalorder %s131_s26, %s131_s26 }
  0x15   : > { %p418_p1 = pneg %p585_p12  ;;  %p425_p7 = scmp.lt.s32.totalorder %s416_s4, %s416_s4 }
  0x17   : > { %p419_p2 = pnand %p418_p1, %p417_p0  ;;  %p426_p8 = por %p425_p7, %p424_p6 }
  0x19   : > { %p420_p3 = pneg %p419_p2 }
  0x1b   : > { %p427_p9 = pnand %p426_p8, %p420_p3 }
  0x1d   : > { %430 = shalt.err (!%p427_p9)
}
  0x1e   : > { %s501_s5 = smov [#allocation6]   ;;  %s361_s6 = sshll.u32 %s499_s17, 10 }
  0x1f   : > { %372 = dma.vmem_to_smem (!%p585_p12), %s131_s26, 16, %s501_s5, [#allocation5]  }
  0x20   : > { %s601_s9 = scalar_lea.hbm %s662_s0, %s361_s6  ;;  %s148_s10 = scalar_lea.vmem [#allocation3], %s340_s30 }
  0x21   : > { %s156_s11 = sshll.u32 %s148_s10, 4  ;;  %s605_s12 = scalar_lea.sflag [#allocation4], %s144_s27  ;;  %s603_s11 = int_to_ptr.vmem [resolvable:$true] %s156_s11 }
  0x22   : > { %s431_s13 = scalar_lea.hbm %s601_s9, 1024  ;;  %p433_p8 = pneg %p589_p13 }
  0x23   : > { %p432_p4 = scmp.ne.s32.totalorder %s601_s9, %s431_s13  ;;  %s436_s19 = scalar_lea.hbm %s662_s0, 2048 }
  0x24   : > { %p437_p11 = scmp.lt.u32.totalorder %s601_s9, %s662_s0  ;;  %p438_p12 = scmp.lt.u32.totalorder %s436_s19, %s431_s13 }
  0x25   : > { %p434_p9 = pnand %p433_p8, %p432_p4  ;;  %p440_p1 = scmp.lt.u32.totalorder %s431_s13, %s601_s9 }
  0x26   : > { %p439_p0 = por %p438_p12, %p437_p11 }
  0x27   : > { %p435_p10 = pneg %p434_p9 }
  0x28   : > { %p441_p2 = por %p440_p1, %p439_p0 }
  0x2a   : > { %p442_p3 = pnand %p441_p2, %p435_p10 }
  0x2c   : > { %445 = shalt.err (!%p442_p3)
}
  0x2d   : > { %s446_s25 = scalar_lea.vmem %s603_s11, 1024  ;;  %s502_s26 = smov [#allocation3]  }
  0x2e   : > { %p447_p6 = scmp.ne.s32.totalorder %s603_s11, %s446_s25  ;;  %s451_s27 = sshll.u32 %s502_s26, 4  ;;  %s452_s27 = int_to_ptr.vmem [resolvable:$false] %s451_s27 }
  0x2f   : > { %s453_s28 = scalar_lea.vmem %s452_s27, 2048  ;;  %p454_p9 = scmp.lt.s32.totalorder %s603_s11, %s452_s27 }
  0x30   : > { %p449_p7 = pnand %p447_p6, %p433_p8  ;;  %p455_p11 = scmp.lt.s32.totalorder %s453_s28, %s446_s25 }
  0x32   : > { %p450_p4 = pneg %p449_p7  ;;  %p456_p12 = por %p455_p11, %p454_p9 }
  0x34   : > { %p457_p0 = pnand %p456_p12, %p450_p4 }
  0x36   : > { %460 = shalt.err (!%p457_p0)
}
  0x37   : > { %s503_s30 = smov 128   ;;  %s504_s4 = smov 8  }
  0x38   : > { %376 = dma.hbm_to_vmem [thread:$0]  (!%p589_p13), %s601_s9, 1024, %s603_s11, %s605_s12, %s503_s30, %s503_s30, %s504_s4  }
  0x39   : > { %p672_p8 = scmp.ne.s32.totalorder %s669_s23, 0 }
  0x3a   : > { %s170_s5 = sand.u32 (!%p672_p8), 1, %s491_s15   ;;  %p673_p10 = scmp.ne.s32.totalorder (!%p672_p8), %s668_s22, 0 }
  0x3b   : > { %168 = sbr.rel (%p672_p8) target bundleno = 208 (0xd0), region = 32  ;;  %s345_s6 = sshll.u32 (!%p672_p8), %s170_s5, 6 }
  0x3c   : > { %s171_s7 = scalar_lea.sflag (!%p672_p8), [#allocation4], %s170_s5  ;;  %s174_s8 = scalar_lea.vmem (!%p672_p8), [#allocation3], %s345_s6 }
  0x42   : > { %478 = dma.done.wait (%p673_p10), %s171_s7, 1024  }
  0x43   : > { %480 = vsyncadd (%p673_p10), %s171_s7, 4294966272 }
  0x44   : > { %482 = dma.done.wait (%p39_p5), [#allocation5], 16  }
  0x45   : > { %484 = vsyncadd (%p39_p5), [#allocation5], 4294967280 }
  0x46   : > { %183 = sfence }
  0x47   : > { %s210_s23 = sld [smem:[#allocation6]]  ;;  %s351_s29 = sld [smem:[#allocation6 + $0x1]]  ;;  %v208_v0 = vld [vmem:[%s174_s8] sm:$0xff]  ;;  %v209_v1 = vld [vmem:[%s174_s8 + $0x8] sm:$0xff]  ;;  %v349_v2 = vld [vmem:[%s174_s8 + $0x10] sm:$0xff]  ;;  %vm253_vm0 = vcmask 80898  }
  0x48   : > { %s354_s9 = sld [smem:[#allocation6 + $0x2]]  ;;  %s357_s10 = sld [smem:[#allocation6 + $0x3]]  ;;  %v350_v3 = vld [vmem:[%s174_s8 + $0x18] sm:$0xff]  ;;  %v352_v5 = vld [vmem:[%s174_s8 + $0x20] sm:$0xff]  ;;  %v353_v6 = vld [vmem:[%s174_s8 + $0x28] sm:$0xff]  ;;  %vm255_vm1 = vcmask 78848  }
  0x49   : > { %s241_s11 = sld [smem:[#allocation2]]  ;;  %v355_v10 = vld [vmem:[%s174_s8 + $0x30] sm:$0xff]  ;;  %v356_v11 = vld [vmem:[%s174_s8 + $0x38] sm:$0xff]  ;;  %s505_s22 = smov 125  }
  0x4a   : > { %p203_p5 = scmp.lt.s32.totalorder %s548_s2, 1 }
  0x4c   : > { %s679_s2 = smov (!%p203_p5, %s548_s2), 1 }
  0x4d   : > { %v211_v4 = vstv %s210_s23  ;;  %v218_v9 = vstv %s351_s29  ;;  %s362_s12 = sshll.u32 %s679_s2, 4 }
  0x4e   : > { %v212_v7 = vmul.f32 %v211_v4, %v208_v0  ;;  %v213_v8 = vmul.f32 %v211_v4, %v209_v1  ;;  %v219_v12 = vmul.f32 %v349_v2, %v218_v9  ;;  %v220_v13 = vmul.f32 %v350_v3, %v218_v9  ;;  %s207_s17 = scalar_lea.vmem %s665_s3, %s362_s12 }
  0x4f   : > { %v227_v14 = vstv %s354_s9  ;;  %v236_v15 = vstv %s357_s10  ;;  %v242_v24 = vstv %s241_s11 }
  0x50   : > { %v228_v16 = vmul.f32 %v352_v5, %v227_v14  ;;  %v229_v17 = vmul.f32 %v353_v6, %v227_v14  ;;  %v221_v18 = vadd.f32 %v219_v12, %v212_v7  ;;  %v222_v19 = vadd.f32 %v220_v13, %v213_v8 }
  0x51   : > { %v237_v20 = vmul.f32 %v355_v10, %v236_v15  ;;  %v238_v21 = vmul.f32 %v356_v11, %v236_v15 }
  0x52   : > { %v230_v22 = vadd.f32 %v228_v16, %v221_v18  ;;  %v231_v23 = vadd.f32 %v229_v17, %v222_v19 }
  0x54   : > { %v239_v25 = vadd.f32 %v237_v20, %v230_v22  ;;  %v240_v26 = vadd.f32 %v238_v21, %v231_v23 }
  0x56   : > { %v243_v27 = vadd.f32 %v242_v24, %v239_v25  ;;  %v244_v28 = vadd.f32 %v242_v24, %v240_v26 }
  0x58   : > { %247 = vrot.lane.b32.xlu0 %v243_v27, %s505_s22 }
  0x5c   : > { %249 = vrot.lane.b32.xlu0 %v244_v28, %s505_s22 }
  0xca   : > { %v248_v29 = vpop.permute.xlu0 %247 }
  0xcb   : > { %254 = vst.msk [vmem:[%s207_s17 - $0x2] sm:$0xfc] %vm253_vm0, %v248_v29 }
  0xce   : > { %v250_v30 = vpop.permute.xlu0 %249 }
  0xcf   : > { %256 = vst.msk [vmem:[%s207_s17 + $0x6] sm:$0x3f] %vm255_vm1, %v250_v30 }
  0xd0 PF: > { %p15_p13 = scmp.ge.s32.totalorder %s551_s18, 4   ;;  %s674_s14 = smov %s491_s15 }
  0xd1   : > { %s675_s15 = smov %s495_s16  ;;  %s676_s16 = smov %s561_s21 }
  0xd2   : > { %s677_s17 = smov %s551_s18  ;;  %17 = sbr.rel (!%p15_p13) target bundleno = 6 (0x6), region = 80 }
  0xd9   :  { %278 = vsyncpa [#allocation4], 1 }
  0xda   :  { %280 = vsyncpa [#allocation4 + $0x1], 1 }
  0xdb   :  { %281 = vsyncpa [#allocation5], 1 }
  0xdc   :  { %283 = vsyncpa [#allocation5 + $0x1], 1 }

</bundles_post_ra>
